<compile_context>
chip_gen: v7x
topology: tpu7x:2x2x1
jax: 0.10.0
libtpu: 0.0.40
codegen_flags: <defaults>
</compile_context>

<pallas_src>
import functools

import jax
import jax.numpy as jnp
from jax.experimental import pallas as pl
from jax.experimental.pallas import tpu as pltpu


def mlp_kernel(x_ref, w1t_ref, b1_ref, w2t_ref, b2_ref, o_ref):
    # x tile: (TB, 6).  Transpose once so the batch rides the lane axis for the
    # rest of the kernel -> hidden and output tensors are lane-dense.
    xt = x_ref[...].T                                            # (6, TB)

    # Layer 1 on the MXU: (32, 6) @ (6, TB) -> (32, TB), f32 accumulation.
    h = jnp.dot(w1t_ref[...], xt, preferred_element_type=jnp.float32)
    h = jnp.tanh(h + b1_ref[...])                                # bias lane-broadcast; tanh on EUP

    # Layer 2: (1, 32) @ (32, TB) -> (1, TB).  Result is already lane-dense, so the
    # store below is a full-width vector store (no masked 1-lane stores).
    y = jnp.dot(w2t_ref[...], h, preferred_element_type=jnp.float32) + b2_ref[...]

    o_ref[...] = y.astype(o_ref.dtype)                           # (1, TB)


def base_model_forward(x, w1, b1, w2, b2, *, block_rows=1024):
    """x: (B, 6) -> (B, 1).  Same math as nn.Sequential(Linear(6,32), Tanh, Linear(32,1)).

    block_rows: batch tile per grid step (multiple of 128).  For large B, 4096-8192 rows
    amortizes the ~0.35us/step overhead and still uses only ~1-2 MiB of VMEM (fits the
    64 MiB VMEM of v7x with lots of headroom).
    """
    B, F = x.shape                 # F = 6
    H = w1.shape[-1]               # 32
    assert block_rows % 128 == 0, "block_rows must be a multiple of 128 (lane width)"

    n_blocks = max(1, pl.cdiv(B, block_rows))
    b_pad = n_blocks * block_rows
    if b_pad != B:
        x = jnp.pad(x, ((0, b_pad - B), (0, 0)))   # padded rows are sliced off below

    # Transposed / column parameter layout for the feature-major kernel (tiny arrays).
    w1t = jnp.transpose(w1)        # (32, 6)
    b1c = jnp.reshape(b1, (H, 1))  # (32, 1)
    w2t = jnp.reshape(w2, (1, H))  # (1, 32)   (w2 is (32, 1); reshape == transpose here)
    b2c = jnp.reshape(b2, (1, 1))  # (1, 1)

    out = pl.pallas_call(
        mlp_kernel,
        out_shape=jax.ShapeDtypeStruct((1, b_pad), x.dtype),     # lane-dense output slab
        grid_spec=pltpu.PrefetchScalarGridSpec(
            num_scalar_prefetch=0,
            grid=(n_blocks,),
            in_specs=[
                pl.BlockSpec((block_rows, F), lambda i: (i, 0)),  # x tile, double-buffered
                pl.BlockSpec((H, F), lambda i: (0, 0)),           # w1^T  (VMEM-resident)
                pl.BlockSpec((H, 1), lambda i: (0, 0)),           # b1    (VMEM-resident)
                pl.BlockSpec((1, H), lambda i: (0, 0)),           # w2^T  (VMEM-resident)
                pl.BlockSpec((1, 1), lambda i: (0, 0)),           # b2    (VMEM-resident)
            ],
            out_specs=pl.BlockSpec((1, block_rows), lambda i: (0, i)),
        ),
        compiler_params=pltpu.CompilerParams(
            dimension_semantics=("parallel",),          # shard batch tiles across cores (v7x)
            vmem_limit_bytes=32 * 1024 * 1024,
        ),
    )(x, w1t, b1c, w2t, b2c)

    # (1, b_pad) -> (b_pad, 1) -> (B, 1)
    return out.reshape(b_pad, 1)[:B]


def init_params(key):
    """Deterministic PyTorch-style Linear init: U(-1/sqrt(fan_in), 1/sqrt(fan_in))."""
    k1, k2, k3, k4 = jax.random.split(key, 4)
    bound1 = 1.0 / jnp.sqrt(6.0)
    bound2 = 1.0 / jnp.sqrt(32.0)
    w1 = jax.random.uniform(k1, (6, 32), jnp.float32, -bound1, bound1)
    b1 = jax.random.uniform(k2, (1, 32), jnp.float32, -bound1, bound1)
    w2 = jax.random.uniform(k3, (32, 1), jnp.float32, -bound2, bound2)
    b2 = jax.random.uniform(k4, (1, 1), jnp.float32, -bound2, bound2)
    return w1, b1, w2, b2


if __name__ == "__main__":
    key = jax.random.PRNGKey(0)
    kx, kp = jax.random.split(key)

    # Small test: B not a multiple of the tile -> exercises the grid (3 steps) and the
    # padding / slicing path.
    B, TB = 300, 128
    x = jax.random.normal(kx, (B, 6), jnp.float32)
    w1, b1, w2, b2 = init_params(kp)

    fwd = jax.jit(functools.partial(base_model_forward, block_rows=TB))
    out = fwd(x, w1, b1, w2, b2)
    jax.block_until_ready(out)

    # Reference check in plain JAX (same math as the nn.Sequential forward).
    ref = jnp.tanh(x @ w1 + b1) @ w2 + b2
    assert out.shape == (B, 1)
    assert jnp.allclose(out, ref, atol=2e-5, rtol=2e-5), float(jnp.max(jnp.abs(out - ref)))

    print("KERNEL_OK")
</pallas_src>

<mosaic_0001>
module attributes {stable_mosaic.version = 11 : i64} {
  func.func @mlp_kernel(%arg0: i32, %arg1: memref<128x6xf32, #tpu.memory_space<vmem>>, %arg2: memref<32x6xf32, #tpu.memory_space<vmem>>, %arg3: memref<32x1xf32, #tpu.memory_space<vmem>>, %arg4: memref<1x32xf32, #tpu.memory_space<vmem>>, %arg5: memref<1x1xf32, #tpu.memory_space<vmem>>, %arg6: memref<1x128xf32, #tpu.memory_space<vmem>>) attributes {dimension_semantics = [#tpu.dimension_semantics<parallel>], iteration_bounds = array<i64: 3>, scalar_prefetch = 0 : i64, scratch_operands = 0 : i64, tpu.core_type = #tpu.core_type<tc>, window_params = [{transform_indices = @transform_0, window_bounds = array<i64: 128, 6>}, {pipeline_mode = #tpu.pipeline_mode<synchronous>, transform_indices = @transform_1, window_bounds = array<i64: 32, 6>}, {pipeline_mode = #tpu.pipeline_mode<synchronous>, transform_indices = @transform_2, window_bounds = array<i64: 32, 1>}, {pipeline_mode = #tpu.pipeline_mode<synchronous>, transform_indices = @transform_3, window_bounds = array<i64: 1, 32>}, {pipeline_mode = #tpu.pipeline_mode<synchronous>, transform_indices = @transform_4, window_bounds = array<i64: 1, 1>}, {transform_indices = @transform_5, window_bounds = array<i64: 1, 128>}]} {
    %c0 = arith.constant 0 : index
    %c0_0 = arith.constant 0 : index
    %0 = vector.load %arg1[%c0, %c0_0] : memref<128x6xf32, #tpu.memory_space<vmem>>, vector<128x6xf32>
    %1 = tpu.transpose %0, [1, 0] : vector<128x6xf32> -> vector<6x128xf32>
    %c0_1 = arith.constant 0 : index
    %c0_2 = arith.constant 0 : index
    %2 = vector.load %arg2[%c0_1, %c0_2] : memref<32x6xf32, #tpu.memory_space<vmem>>, vector<32x6xf32>
    %cst = arith.constant dense<0.000000e+00> : vector<32x128xf32>
    %3 = tpu.matmul %2, %1, %cst {dimension_numbers = #tpu.dot_dimension_numbers<[1], [0], [0], [1], [0, 0, 1, 1], [], []>} : vector<32x6xf32>, vector<6x128xf32>, vector<32x128xf32> -> vector<32x128xf32>
    %c0_3 = arith.constant 0 : index
    %c0_4 = arith.constant 0 : index
    %4 = vector.load %arg3[%c0_3, %c0_4] : memref<32x1xf32, #tpu.memory_space<vmem>>, vector<32x1xf32>
    %5 = vector.broadcast %4 : vector<32x1xf32> to vector<32x128xf32>
    %6 = arith.addf %3, %5 : vector<32x128xf32>
    %7 = math.tanh %6 : vector<32x128xf32>
    %c0_5 = arith.constant 0 : index
    %c0_6 = arith.constant 0 : index
    %8 = vector.load %arg4[%c0_5, %c0_6] : memref<1x32xf32, #tpu.memory_space<vmem>>, vector<1x32xf32>
    %cst_7 = arith.constant dense<0.000000e+00> : vector<1x128xf32>
    %9 = tpu.matmul %8, %7, %cst_7 {dimension_numbers = #tpu.dot_dimension_numbers<[1], [0], [0], [1], [0, 0, 1, 1], [], []>} : vector<1x32xf32>, vector<32x128xf32>, vector<1x128xf32> -> vector<1x128xf32>
    %c0_8 = arith.constant 0 : index
    %c0_9 = arith.constant 0 : index
    %10 = vector.load %arg5[%c0_8, %c0_9] : memref<1x1xf32, #tpu.memory_space<vmem>>, vector<1x1xf32>
    %11 = vector.broadcast %10 : vector<1x1xf32> to vector<1x128xf32>
    %12 = arith.addf %9, %11 : vector<1x128xf32>
    %c0_10 = arith.constant 0 : index
    %c0_11 = arith.constant 0 : index
    %13 = vector.load %arg6[%c0_10, %c0_11] : memref<1x128xf32, #tpu.memory_space<vmem>>, vector<1x128xf32>
    tpu.vector_store %arg6[%c0_10, %c0_11], %12 {strides = array<i32>} : memref<1x128xf32, #tpu.memory_space<vmem>>, vector<1x128xf32>,
    return
  }
  func.func @transform_0(%arg0: i32) -> (i32, i32) {
    %c0_i32 = arith.constant 0 : i32
    %c0_i32_0 = arith.constant 0 : i32
    return %arg0, %c0_i32 : i32, i32
  }
  func.func @transform_1(%arg0: i32) -> (i32, i32) {
    %c0_i32 = arith.constant 0 : i32
    %c0_i32_0 = arith.constant 0 : i32
    %c0_i32_1 = arith.constant 0 : i32
    return %c0_i32, %c0_i32_0 : i32, i32
  }
  func.func @transform_2(%arg0: i32) -> (i32, i32) {
    %c0_i32 = arith.constant 0 : i32
    %c0_i32_0 = arith.constant 0 : i32
    %c0_i32_1 = arith.constant 0 : i32
    return %c0_i32, %c0_i32_0 : i32, i32
  }
  func.func @transform_3(%arg0: i32) -> (i32, i32) {
    %c0_i32 = arith.constant 0 : i32
    %c0_i32_0 = arith.constant 0 : i32
    %c0_i32_1 = arith.constant 0 : i32
    return %c0_i32, %c0_i32_0 : i32, i32
  }
  func.func @transform_4(%arg0: i32) -> (i32, i32) {
    %c0_i32 = arith.constant 0 : i32
    %c0_i32_0 = arith.constant 0 : i32
    %c0_i32_1 = arith.constant 0 : i32
    return %c0_i32, %c0_i32_0 : i32, i32
  }
  func.func @transform_5(%arg0: i32) -> (i32, i32) {
    %c0_i32 = arith.constant 0 : i32
    %c0_i32_0 = arith.constant 0 : i32
    return %c0_i32, %arg0 : i32, i32
  }
}

</mosaic_0001>

<bundles_post_ra>
// kernel: base_model_forward.1
= control target key start
LH: loop header
LB: loop body
LE: loop exit
PB: predicated region body
PF: predicated region fallthrough
CT: control target
= control target key end

     0   :  { %s777_s20 = smov 0   ;;  %s886_s0 = inlined_call_operand.vmem [shape: f32[384,6], index: 0, kind: input, shape index: {}]   ;;  %s887_s1 = inlined_call_operand.vmem [shape: f32[32,6], index: 1, kind: input, shape index: {}]   ;;  %s888_s2 = inlined_call_operand.vmem [shape: f32[32,1], index: 2, kind: input, shape index: {}]   ;;  %s889_s3 = inlined_call_operand.vmem [shape: f32[1,32], index: 3, kind: input, shape index: {}]   ;;  %s890_s4 = inlined_call_operand.<no memory space> [shape: f32[1,1], index: 4, kind: input, shape index: {}]   ;;  %s891_s5 = inlined_call_operand.vmem [shape: f32[1,384], index: 5, kind: output, shape index: {}]  }
   0x1   :  { %v10_v0 = vstv %s890_s4 }
   0x2   :  { %11 = vst [vmem:[#allocation2] sm:$0x1] %v10_v0 }
   0x3 LB: > { %s783_s21 = sadd.s32 4294967295, %s738_s20   ;;  %p556_p0 = scmp.ge.s32.totalorder %s738_s20, 1  ;;  %s738_s20 = sphi %s777_s20, %s17_s20  }
   0x4   : > { %p190_p1 = scmp.lt.s32.totalorder %s738_s20, 4 }
   0x6   : > { %p191_p2 = pnand %p556_p0, %p190_p1 }
   0x7   : > { %s557_s22 = sshll.u32 (!%p191_p2), %s783_s21, 4  ;;  %vm269_vm0 = vcmask (!%p191_p2), 48128   ;;  %v241_v1 = vld [vmem:[%s887_s1] sm:$0xff] (!%p191_p2)  ;;  %v740_v2 = vmov (!%p191_p2), 0   ;;  %v247_v4 = vld [vmem:[%s888_s2 + $0x10] sm:$0xff] (!%p191_p2)  ;;  %v246_v5 = vld [vmem:[%s888_s2 + $0x8] sm:$0xff] (!%p191_p2)  ;;  %v426_v57 = vlaneseq (!%p191_p2) }
   0x8   : > { %194 = sbr.rel (%p191_p2) target bundleno = 535 (0x217), region = 40  ;;  %p217_p3 = scmp.lt.s32.totalorder (!%p191_p2), %s557_s22, 47  ;;  %639 = vmatprep.mubr.msk.f32.mxu0 (!%p191_p2), %vm269_vm0, %v241_v1  ;;  %722 = vset.pattern.permute.xlu0 (!%p191_p2), %v740_v2  ;;  %v245_v3 = vld [vmem:[%s888_s2] sm:$0xff] (!%p191_p2)  ;;  %v248_v6 = vld [vmem:[%s888_s2 + $0x18] sm:$0xff] (!%p191_p2)  ;;  %vm811_vm1 = vmpackc.low (!%p191_p2), %vm269_vm0, %vm269_vm0  ;;  %v741_v36 = vmov (!%p191_p2), 0.0|0.0   ;;  %vm742_vm2 = vmmov (!%p191_p2), 0  }
   0x9   : > { %251 = vperm.xlu0 (!%p191_p2), %722, %v245_v3   ;;  %723 = vset.pattern.permute.xlu1 (!%p191_p2), %v740_v2  ;;  %v420_v8 = vld [vmem:[#allocation2] sm:$0x1] (!%p191_p2)  ;;  %v242_v33 = vld [vmem:[%s887_s1 + $0x8] sm:$0xff] (!%p191_p2)  ;;  %v243_v34 = vld [vmem:[%s887_s1 + $0x10] sm:$0xff] (!%p191_p2)  ;;  %v743_v37 = vmov (!%p191_p2), 0.0   ;;  %vm430_vm3 = vcmask (!%p191_p2), 261120  }
   0xa   : > { %261 = vperm.xlu1 (!%p191_p2), %723, %v247_v4   ;;  %v244_v35 = vld [vmem:[%s887_s1 + $0x18] sm:$0xff] (!%p191_p2)  ;;  %704 = vmatprep.subr.bf16.mxu1 (!%p191_p2), %v741_v36  ;;  %v419_v56 = vld [vmem:[%s889_s3] sm:$0x1] (!%p191_p2)  ;;  %v427_v58 = vshrl.u32 (!%p191_p2), %v426_v57, 7  ;;  %p222_p4 = scmp.lt.s32.totalorder (!%p191_p2), %s783_s21, 2 }
   0xb   : > { %653 = vmatprep.mubr.msk.f32.mxu1 (!%p191_p2), %vm742_vm2, %v743_v37 }
   0xc   : > { %v428_v59 = vsub.s32 (!%p191_p2), 0, %v427_v58 }
   0xd   : > { %256 = vperm.xlu0 (!%p191_p2), %722, %v246_v5  }
   0xe   : > { %266 = vperm.xlu1 (!%p191_p2), %723, %v248_v6  }
   0xf   : > { %s895_s22 = smov (!%p217_p3, %s557_s22), 47  ;;  %s897_s21 = smov (!%p222_p4, %s783_s21), 2 }
  0x10   : > { %s558_s7 = sshll.u32 %s895_s22, 3  ;;  %s224_s4 = scalar_lea.vmem %s891_s5, %s897_s21 }
  0x11   : > { %s807_s10 = scalar_lea.vmem %s886_s0, %s558_s7  ;;  %423 = vperm.xlu0 %722, %v420_v8  }
  0x12   : > { %v225_v9 = vld [vmem:[%s807_s10] sm:$0xff]  ;;  %v226_v10 = vld [vmem:[%s807_s10 + $0x8] sm:$0xff]  ;;  %v227_v11 = vld [vmem:[%s807_s10 + $0x10] sm:$0xff] }
  0x13   : > { %v656_v12 = vpack.c.bf16 %v226_v10, %v225_v9  ;;  %v228_v13 = vld [vmem:[%s807_s10 + $0x18] sm:$0xff]  ;;  %v229_v15 = vld [vmem:[%s807_s10 + $0x20] sm:$0xff]  ;;  %v230_v16 = vld [vmem:[%s807_s10 + $0x28] sm:$0xff] }
  0x14   : > { %v662_v14 = vpack.c.bf16 %v228_v13, %v227_v11  ;;  %v668_v17 = vpack.c.bf16 %v230_v16, %v229_v15  ;;  %v231_v18 = vld [vmem:[%s807_s10 + $0x30] sm:$0xff]  ;;  %v232_v19 = vld [vmem:[%s807_s10 + $0x38] sm:$0xff]  ;;  %v233_v21 = vld [vmem:[%s807_s10 + $0x40] sm:$0xff] }
  0x15   : > { %658 = vmatprep.subr.msk.bf16.mxu0 %vm811_vm1, %v656_v12  ;;  %v674_v20 = vpack.c.bf16 %v232_v19, %v231_v18  ;;  %v234_v22 = vld [vmem:[%s807_s10 + $0x48] sm:$0xff]  ;;  %v235_v24 = vld [vmem:[%s807_s10 + $0x50] sm:$0xff]  ;;  %v236_v25 = vld [vmem:[%s807_s10 + $0x58] sm:$0xff] }
  0x16   : > { %661 = vmatpush3.bf16.xpose.msk.msra.mxu0 %vm811_vm1, %v656_v12  ;;  %v680_v23 = vpack.c.bf16 %v234_v22, %v233_v21  ;;  %v686_v26 = vpack.c.bf16 %v236_v25, %v235_v24  ;;  %v237_v27 = vld [vmem:[%s807_s10 + $0x60] sm:$0xff]  ;;  %v238_v28 = vld [vmem:[%s807_s10 + $0x68] sm:$0xff]  ;;  %v239_v30 = vld [vmem:[%s807_s10 + $0x70] sm:$0xff] }
  0x17   : > { %664 = vmatprep.subr.msk.bf16.mxu0 %vm811_vm1, %v662_v14  ;;  %v692_v29 = vpack.c.bf16 %v238_v28, %v237_v27  ;;  %v240_v31 = vld [vmem:[%s807_s10 + $0x78] sm:$0xff] }
  0x18   : > { %v698_v32 = vpack.c.bf16 %v240_v31, %v239_v30 }
  0x1e   : > { %667 = vmatpush3.bf16.xpose.msk.msra.mxu0 %vm811_vm1, %v662_v14 }
  0x1f   : > { %670 = vmatprep.subr.msk.bf16.mxu0 %vm811_vm1, %v668_v17 }
  0x26   : > { %673 = vmatpush3.bf16.xpose.msk.msra.mxu0 %vm811_vm1, %v668_v17 }
  0x27   : > { %676 = vmatprep.subr.msk.bf16.mxu0 %vm811_vm1, %v674_v20 }
  0x2e   : > { %679 = vmatpush3.bf16.xpose.msk.msra.mxu0 %vm811_vm1, %v674_v20 }
  0x2f   : > { %682 = vmatprep.subr.msk.bf16.mxu0 %vm811_vm1, %v680_v23 }
  0x36   : > { %685 = vmatpush3.bf16.xpose.msk.msra.mxu0 %vm811_vm1, %v680_v23 }
  0x37   : > { %688 = vmatprep.subr.msk.bf16.mxu0 %vm811_vm1, %v686_v26 }
  0x3e   : > { %691 = vmatpush3.bf16.xpose.msk.msra.mxu0 %vm811_vm1, %v686_v26 }
  0x3f   : > { %694 = vmatprep.subr.msk.bf16.mxu0 %vm811_vm1, %v692_v29 }
  0x46   : > { %697 = vmatpush3.bf16.xpose.msk.msra.mxu0 %vm811_vm1, %v692_v29 }
  0x47   : > { %700 = vmatprep.subr.msk.bf16.mxu0 %vm811_vm1, %v698_v32 }
  0x4e   : > { %703 = vmatpush3.bf16.xpose.msk.msra.mxu0 %vm811_vm1, %v698_v32 }
  0x55   : > { %640 = vmatmul.mubr.msk.f32.vlgmr.msra.gmra.mrb[0].mxu0 %vm269_vm0, %v242_v33 }
  0x56   : > { %642 = vmatprep.mubr.msk.f32.mxu0 %vm269_vm0, %v243_v34 }
  0x59   : > { %643 = vmatmul.mubr.msk.f32.gmra.mrb[2].mxu0 %vm269_vm0, %v244_v35 }
  0x88   : > { %v252_v38 = vpop.permute.xlu0 %251 }
  0x89   : > { %v262_v39 = vpop.permute.xlu1 %261 }
  0x8c   : > { %v257_v40 = vpop.permute.xlu0 %256 }
  0x8d   : > { %v267_v45 = vpop.permute.xlu1 %266 }
  0x90   : > { %v424_v60 = vpop.permute.xlu0 %423 }
  0x91   : > { %v429_v61 = vrot.slane %v424_v60, %v428_v59 }
 0x128   : > { %v641_v41 = vpop.f32.mrb[0].mxu0 }
 0x129   : > { %v402_v42 = vadd.f32 %v641_v41, %v257_v40  ;;  %v396_v43 = vpop.f32.mrb[1].mxu0 }
 0x12a   : > { %v397_v44 = vadd.f32 %v396_v43, %v252_v38 }
 0x12b   : > { %724 = vtanh.f32 %v402_v42 }
 0x12c   : > { %726 = vtanh.f32 %v397_v44  ;;  %v644_v46 = vpop.f32.mrb[2].mxu0 }
 0x12d   : > { %v412_v47 = vadd.f32 %v644_v46, %v267_v45  ;;  %v406_v48 = vpop.f32.mrb[3].mxu0 }
 0x12e   : > { %v407_v49 = vadd.f32 %v406_v48, %v262_v39 }
 0x12f   : > { %728 = vtanh.f32 %v412_v47 }
 0x130   : > { %730 = vtanh.f32 %v407_v49 }
 0x135   : > { %v725_v50 = vpop.eup %724 }
 0x136   : > { %v727_v51 = vpop.eup %726 }
 0x137   : > { %v705_v52 = vpack.c.bf16 %v725_v50, %v727_v51 }
 0x139   : > { %v729_v53 = vpop.eup %728  ;;  %706 = vmatpush3.bf16.msra.mxu1 %v705_v52 }
 0x13a   : > { %v731_v54 = vpop.eup %730  ;;  %707 = vmatprep.subr.bf16.mxu1 %v741_v36 }
 0x13b   : > { %v708_v55 = vpack.c.bf16 %v729_v53, %v731_v54 }
 0x13d   : > { %709 = vmatpush3.bf16.msra.mxu1 %v708_v55 }
 0x140   : > { %654 = vmatmul.mubr.msk.f32.vlgmr.msra.gmra.mrb[0].mxu1 %vm430_vm3, %v419_v56 }
 0x213   : > { %v500_v62 = vpop.f32.mrb[0].mxu1 }
 0x214   : > { %v501_v63 = vadd.f32 %v500_v62, %v429_v61  ;;  %v655_v0 = vpop.f32.mrb[1].mxu1 }
 0x216   : > { %504 = vst [vmem:[%s224_s4] sm:$0x1] %v501_v63 }
 0x217 PF: > { %s17_s20 = sadd.s32 1, %s738_s20  }
 0x218   : > { %p14_p5 = scmp.ge.s32.totalorder %s17_s20, 5  }
 0x21a   :  { %16 = sbr.rel (!%p14_p5) target bundleno = 3 (0x3), region = 70 }

</bundles_post_ra>
